<compile_context>
chip_gen: v5e
topology: v5e:2x2
jax: 0.10.0
libtpu: 0.0.40
codegen_flags: <defaults>
</compile_context>

<pallas_src>
import jax
import jax.numpy as jnp
from jax.experimental import pallas as pl
from jax.experimental.pallas import tpu as pltpu


def _l2_normalize_kernel(x_ref, o_ref):
    # x_ref / o_ref: (TB, C) tile in VMEM; reduction along the lane-major C axis.
    x = x_ref[...].astype(jnp.float32)
    ss = jnp.sum(x * x, axis=-1, keepdims=True)   # (TB, 1) sum of squares
    inv = jax.lax.rsqrt(ss)                       # EUP; no eps -> matches torch.norm divide
    o_ref[...] = (x * inv).astype(o_ref.dtype)


# Portable VMEM budget: v7x has 64 MiB physical per TC, v5e/v6e have 128 MiB.
_VMEM_LIMIT_BYTES = 64 * 1024 * 1024
# Budget for the double-buffered in+out blocks plus in-kernel f32 temps.
_BLOCK_BUDGET_BYTES = 24 * 1024 * 1024


def _pick_tile_rows(B, C, dtype):
    dtype_bytes = jnp.dtype(dtype).itemsize
    # Sublane packing: 8 rows for f32, 16 for bf16, 32 for 8-bit dtypes.
    pack = 8 * max(1, 4 // dtype_bytes)
    # Per-row VMEM: 2 arrays (in+out) x 2 buffers x C x dtype_bytes, plus ~2 f32 temps.
    per_row = C * (4 * dtype_bytes + 2 * 4)
    t = max(1, _BLOCK_BUDGET_BYTES // per_row)
    t = min(t, 2048, B)
    if t < B:
        # Block sublane dim must be a multiple of the packing (or equal full B).
        t = max(pack, (t // pack) * pack)
    return t


def l2_normalize_2d(x):
    """x: (B, C); returns x / ||x||_2 along axis -1 (keepdim broadcast)."""
    B, C = x.shape
    tile_b = _pick_tile_rows(B, C, x.dtype)
    n_blocks = pl.cdiv(B, tile_b)
    B_pad = n_blocks * tile_b
    x_in = x if B_pad == B else jnp.pad(x, ((0, B_pad - B), (0, 0)))

    out = pl.pallas_call(
        _l2_normalize_kernel,
        out_shape=jax.ShapeDtypeStruct((B_pad, C), x.dtype),
        grid=(n_blocks,),
        in_specs=[pl.BlockSpec((tile_b, C), lambda i: (i, 0))],
        out_specs=pl.BlockSpec((tile_b, C), lambda i: (i, 0)),
        compiler_params=pltpu.CompilerParams(
            dimension_semantics=("parallel",),
            vmem_limit_bytes=_VMEM_LIMIT_BYTES,
        ),
    )(x_in)
    return out if B_pad == B else out[:B]


def normalize(x, dim):
    """General entry point matching the PyTorch module: x / ||x||_2 along `dim`."""
    dim = dim % x.ndim
    x_moved = jnp.moveaxis(x, dim, -1)
    lead_shape = x_moved.shape[:-1]
    C = x_moved.shape[-1]
    out2d = l2_normalize_2d(x_moved.reshape((-1, C)))
    out = out2d.reshape(lead_shape + (C,))
    return jnp.moveaxis(out, -1, dim)


if __name__ == "__main__":
    key = jax.random.PRNGKey(0)
    # Small shape consistent with Normalize(dim=1) on (batch, channels) features.
    B, C = 16, 128
    x = jax.random.normal(key, (B, C), dtype=jnp.float32)

    out = normalize(x, dim=1)
    out = jax.block_until_ready(out)

    # Reference check (same semantics as torch.norm(p=2, dim=1, keepdim=True) divide).
    ref = x / jnp.linalg.norm(x, axis=1, keepdims=True)
    assert jnp.allclose(out, ref, atol=1e-5, rtol=1e-5), "mismatch vs reference"

    print("KERNEL_OK")
</pallas_src>

<mosaic_0001>
module attributes {stable_mosaic.version = 11 : i64} {
  func.func @_l2_normalize_kernel(%arg0: i32, %arg1: memref<16x128xf32, #tpu.memory_space<vmem>>, %arg2: memref<16x128xf32, #tpu.memory_space<vmem>>) attributes {dimension_semantics = [#tpu.dimension_semantics<parallel>], iteration_bounds = array<i64: 1>, scalar_prefetch = 0 : i64, scratch_operands = 0 : i64, tpu.core_type = #tpu.core_type<tc>, window_params = [{transform_indices = @transform_0, window_bounds = array<i64: 16, 128>}, {transform_indices = @transform_1, window_bounds = array<i64: 16, 128>}]} {
    %c0 = arith.constant 0 : index
    %c0_0 = arith.constant 0 : index
    %0 = vector.load %arg1[%c0, %c0_0] : memref<16x128xf32, #tpu.memory_space<vmem>>, vector<16x128xf32>
    %1 = arith.mulf %0, %0 : vector<16x128xf32>
    %cst = arith.constant dense<0.000000e+00> : vector<16xf32>
    %2 = vector.multi_reduction <add>, %1, %cst [1] : vector<16x128xf32> to vector<16xf32>
    %3 = vector.shape_cast %2 : vector<16xf32> to vector<16x1xf32>
    %4 = math.rsqrt %3 : vector<16x1xf32>
    %5 = vector.broadcast %4 : vector<16x1xf32> to vector<16x128xf32>
    %6 = arith.mulf %0, %5 : vector<16x128xf32>
    %c0_1 = arith.constant 0 : index
    %c0_2 = arith.constant 0 : index
    %7 = vector.load %arg2[%c0_1, %c0_2] : memref<16x128xf32, #tpu.memory_space<vmem>>, vector<16x128xf32>
    tpu.vector_store %arg2[%c0_1, %c0_2], %6 {strides = array<i32>} : memref<16x128xf32, #tpu.memory_space<vmem>>, vector<16x128xf32>,
    return
  }
  func.func @transform_0(%arg0: i32) -> (i32, i32) {
    %c0_i32 = arith.constant 0 : i32
    %c0_i32_0 = arith.constant 0 : i32
    return %arg0, %c0_i32 : i32, i32
  }
  func.func @transform_1(%arg0: i32) -> (i32, i32) {
    %c0_i32 = arith.constant 0 : i32
    %c0_i32_0 = arith.constant 0 : i32
    return %arg0, %c0_i32 : i32, i32
  }
}

</mosaic_0001>

<bundles_post_ra>
// kernel: tpu_custom_call.1
= control target key start
LH: loop header
LB: loop body
LE: loop exit
PB: predicated region body
PF: predicated region fallthrough
CT: control target
= control target key end

     0   :  { %6 = vsyncpa [#allocation3], 0  ;;  %s162_s0 = inlined_call_operand.hbm [shape: f32[16,128], index: 0, kind: input, shape index: {}]   ;;  %s163_s1 = inlined_call_operand.hbm [shape: f32[16,128], index: 1, kind: output, shape index: {}]  }
   0x1   :  { %7 = vsyncpa [#allocation4], 0  ;;  %s12_s8 = sshll.u32 %s162_s0, 4  ;;  %s136_s9 = smov [#allocation2]   ;;  %s13_s8 = int_to_ptr.hbm [resolvable:$true] %s12_s8 }
   0x2   :  { %s14_s10 = sshll.u32 %s136_s9, 4  ;;  %s137_s11 = smov 128   ;;  %s15_s10 = int_to_ptr.vmem [resolvable:$true] %s14_s10 }
   0x3   :  { %s138_s12 = smov 8  }
   0x4   :  { %20 = dma.hbm_to_vmem [thread:$0]  %s13_s8, 256, %s15_s10, [#allocation3], %s137_s11, %s137_s11, %s138_s12  }
   0x5   :  { %132 = dma.done.wait [#allocation3], 256  }
   0x6   :  { %133 = vsyncadd [#allocation3], 4294967040  ;;  %v25_v0 = vld [vmem:[#allocation2] sm:$0xff]  ;;  %v26_v2 = vld [vmem:[#allocation2 + $0x8] sm:$0xff]  ;;  %s139_s0 = smov [#allocation5]   ;;  %s63_s16 = sshll.u32 %s163_s1, 4  ;;  %s64_s16 = int_to_ptr.hbm [resolvable:$true] %s63_s16 }
   0x7   :  { %v27_v1 = vmul.f32 %v25_v0, %v25_v0  ;;  %v28_v3 = vmul.f32 %v26_v2, %v26_v2  ;;  %s61_s13 = sshll.u32 %s139_s0, 4  ;;  %s62_s13 = int_to_ptr.vmem [resolvable:$true] %s61_s13 }
   0x9   :  { %29 = vadd.xlane.f32.xlu0 %v27_v1 }
  0x11   :  { %31 = vadd.xlane.f32.xlu0 %v28_v3 }
  0x7c   :  { %v30_v4 = vpop.xlane.xlu0 %29 }
  0x7d   :  { %80 = vrsqrt.f32 %v30_v4  ;;  %vm39_vm1 = vweird.f32 %v30_v4 }
  0x83   :  { %v81_v5 = vpop.eup %80 }
  0x84   :  { %v34_v6 = vmul.f32 %v81_v5, %v30_v4  ;;  %v32_v7 = vpop.xlane.xlu0 %31  ;;  %vm40_vm0 = vweird.f32 %v81_v5 }
  0x85   :  { %82 = vrsqrt.f32 %v32_v7  ;;  %vm41_vm2 = vmor %vm39_vm1, %vm40_vm0  ;;  %vm49_vm4 = vweird.f32 %v32_v7 }
  0x86   :  { %v35_v8 = vmul.f32 %v81_v5, %v34_v6 }
  0x88   :  { %v36_v9 = vmul.f32 0.5, %v35_v8 }
  0x8a   :  { %v37_v10 = vsub.f32 1.5, %v36_v9 }
  0x8b   :  { %v83_v11 = vpop.eup %82 }
  0x8c   :  { %v38_v12 = vmul.f32 %v81_v5, %v37_v10  ;;  %v44_v13 = vmul.f32 %v83_v11, %v32_v7  ;;  %vm50_vm3 = vweird.f32 %v83_v11 }
  0x8d   :  { %vm51_vm5 = vmor %vm49_vm4, %vm50_vm3 }
  0x8e   :  { %v42_v14 = vsel %vm41_vm2, %v81_v5, %v38_v12  ;;  %v45_v15 = vmul.f32 %v83_v11, %v44_v13 }
  0x8f   :  { %v53_v16 = vmul.f32 %v42_v14, %v25_v0 }
  0x90   :  { %v46_v17 = vmul.f32 0.5, %v45_v15 }
  0x91   :  { %55 = vst [vmem:[#allocation5] sm:$0xff] %v53_v16 }
  0x92   :  { %v47_v18 = vsub.f32 1.5, %v46_v17 }
  0x94   :  { %v48_v19 = vmul.f32 %v83_v11, %v47_v18 }
  0x96   :  { %v52_v20 = vsel %vm51_vm5, %v83_v11, %v48_v19 }
  0x97   :  { %v54_v21 = vmul.f32 %v52_v20, %v26_v2 }
  0x99   :  { %56 = vst [vmem:[#allocation5 + $0x8] sm:$0xff] %v54_v21 }
  0x9a   :  { %69 = dma.vmem_to_hbm [thread:$0]  %s62_s13, 256, %s64_s16, [#allocation4], %s137_s11, %s137_s11, %s138_s12  }
  0x9b   :  { %134 = dma.done.wait [#allocation4], 256  }
  0x9c   :  { %135 = vsyncadd [#allocation4], 4294967040 }
  0x9d   :  { %74 = vsyncpa [#allocation3], 1 }
  0x9e   :  { %75 = vsyncpa [#allocation4], 1 }

</bundles_post_ra>
